<compile_context>
chip_gen: v6e
topology: v6e:2x2x1
jax: 0.10.0
libtpu: 0.0.40
codegen_flags: <defaults>
</compile_context>

<pallas_src>
import functools

import jax
import jax.numpy as jnp
from jax.experimental import pallas as pl
from jax.experimental.pallas import tpu as pltpu


def _round_up(x, m):
    return ((x + m - 1) // m) * m


def _dqn_kernel(x_ref,
                w1_ref, b1_ref,
                w2_ref, b2_ref,
                w3_ref, b3_ref,
                w4_ref, b4_ref,
                out_ref):
    # fc1 + ReLU : (TB, in) @ (in, 128) -> f32 accumulate, elementwise in f32.
    h = jnp.dot(x_ref[...], w1_ref[...], preferred_element_type=jnp.float32)
    h = jnp.maximum(h + b1_ref[...], 0.0).astype(jnp.bfloat16)

    # fc2 + ReLU : (TB, 128) @ (128, 64)
    h = jnp.dot(h, w2_ref[...], preferred_element_type=jnp.float32)
    h = jnp.maximum(h + b2_ref[...], 0.0).astype(jnp.bfloat16)

    # fc3 + ReLU : (TB, 64) @ (64, 32)
    h = jnp.dot(h, w3_ref[...], preferred_element_type=jnp.float32)
    h = jnp.maximum(h + b3_ref[...], 0.0).astype(jnp.bfloat16)

    # fc4 (no activation) : (TB, 32) @ (32, out) -> true-width f32 store.
    out = jnp.dot(h, w4_ref[...], preferred_element_type=jnp.float32) + b4_ref[...]
    out_ref[...] = out.astype(out_ref.dtype)


def prepare_params(params):
    """One-time param prep (hoisted out of the per-call forward).

    Weights (stored (in_features, out_features), i.e. transposed vs
    torch.nn.Linear) are cast to bf16 for the MXU; biases stay f32 as (1, out).
    If the input feature dim ever grows past 128, w1's rows are zero-padded to
    a multiple of 128 so the fc1 contraction / x loads stay lane-dense; at the
    toy in=16 size no padding is added (it would only inflate x read bytes).
    """
    in_features = params["w1"].shape[0]
    in_pad = in_features if in_features <= 128 else _round_up(in_features, 128)

    def prep_w(w, rows=None):
        w = jnp.asarray(w, jnp.float32)
        if rows is not None and rows != w.shape[0]:
            w = jnp.pad(w, ((0, rows - w.shape[0]), (0, 0)))
        return w.astype(jnp.bfloat16)

    def prep_b(b):
        return jnp.asarray(b, jnp.float32).reshape(1, -1)

    return {
        "w1": prep_w(params["w1"], in_pad), "b1": prep_b(params["b1"]),
        "w2": prep_w(params["w2"]),         "b2": prep_b(params["b2"]),
        "w3": prep_w(params["w3"]),         "b3": prep_b(params["b3"]),
        "w4": prep_w(params["w4"]),         "b4": prep_b(params["b4"]),
    }


@functools.partial(jax.jit, static_argnames=("tb_max",))
def dqn_forward(x, prepared, tb_max=1024):
    """x: (B, input_size) f32. prepared: output of prepare_params()."""
    B, in_features = x.shape
    in_pad = prepared["w1"].shape[0]
    out_size = prepared["w4"].shape[1]

    # Activations feed the MXU in bf16; pad feature dim only if w1 was padded.
    x = x.astype(jnp.bfloat16)
    if in_pad != in_features:
        x = jnp.pad(x, ((0, 0), (0, in_pad - in_features)))

    # Batch tiling: TB rows per step (multiple of 8 sublanes). Force >= 2
    # "parallel" grid steps whenever the batch allows so both v7x TensorCores
    # get work; cap at tb_max to amortize the ~0.35 us per-step overhead.
    B8 = _round_up(B, 8)
    TB = min(_round_up(tb_max, 8), B8)
    if B8 // TB < 2 and B8 >= 16:
        TB = _round_up(-(-B8 // 2), 8)          # ceil(B8/2), sublane-aligned
    B_pad = _round_up(B, TB)
    if B_pad != B:
        x = jnp.pad(x, ((0, B_pad - B), (0, 0)))
    grid = (B_pad // TB,)

    # x / out move per grid step; parameters stay VMEM-resident (constant map).
    x_spec = pl.BlockSpec((TB, in_pad), lambda i: (i, 0))
    out_spec = pl.BlockSpec((TB, out_size), lambda i: (i, 0))

    def resident(a):
        return pl.BlockSpec(a.shape, lambda i: (0, 0))

    args = (x,
            prepared["w1"], prepared["b1"],
            prepared["w2"], prepared["b2"],
            prepared["w3"], prepared["b3"],
            prepared["w4"], prepared["b4"])
    in_specs = [x_spec] + [resident(a) for a in args[1:]]

    # Advisory cost hint for XLA scheduling around this short, DMA-bound kernel.
    h1 = prepared["w1"].shape[1]
    h2 = prepared["w2"].shape[1]
    h3 = prepared["w3"].shape[1]
    flops = 2 * B_pad * (in_pad * h1 + h1 * h2 + h2 * h3 + h3 * out_size)
    param_bytes = sum(int(a.size) * a.dtype.itemsize for a in args[1:])
    bytes_accessed = B_pad * (in_pad * 2 + out_size * 4) + param_bytes

    out = pl.pallas_call(
        _dqn_kernel,
        out_shape=jax.ShapeDtypeStruct((B_pad, out_size), jnp.float32),
        grid=grid,
        in_specs=in_specs,
        out_specs=out_spec,
        compiler_params=pltpu.CompilerParams(
            dimension_semantics=("parallel",),
            vmem_limit_bytes=32 * 1024 * 1024,
        ),
        cost_estimate=pl.CostEstimate(
            flops=flops, transcendentals=0, bytes_accessed=bytes_accessed),
    )(*args)

    # Drop batch padding rows (fuses with the call under jit).
    return out[:B, :]


def init_params(key, input_size, output_size):
    """Deterministic init matching PyTorch Linear shapes (stored transposed)."""
    sizes = [(input_size, 128), (128, 64), (64, 32), (32, output_size)]
    params = {}
    for i, (fan_in, fan_out) in enumerate(sizes, start=1):
        key, kw, kb = jax.random.split(key, 3)
        bound = 1.0 / jnp.sqrt(jnp.float32(fan_in))
        params[f"w{i}"] = jax.random.uniform(
            kw, (fan_in, fan_out), jnp.float32, -bound, bound)
        params[f"b{i}"] = jax.random.uniform(
            kb, (1, fan_out), jnp.float32, -bound, bound)
    return params


def reference_forward(x, params):
    """Pure-f32 reference matching the PyTorch module."""
    h = jnp.maximum(x @ params["w1"] + params["b1"], 0.0)
    h = jnp.maximum(h @ params["w2"] + params["b2"], 0.0)
    h = jnp.maximum(h @ params["w3"] + params["b3"], 0.0)
    return h @ params["w4"] + params["b4"]


if __name__ == "__main__":
    key = jax.random.PRNGKey(0)
    batch, input_size, output_size = 2, 16, 8

    key, kx = jax.random.split(key)
    x = jax.random.normal(kx, (batch, input_size), jnp.float32)
    params = init_params(key, input_size, output_size)
    prep = prepare_params(params)

    # bf16 matmul inputs (f32 accumulation) -> compare vs f32 ref with a
    # correspondingly loosened tolerance.
    ATOL = RTOL = 5e-2

    out = jax.block_until_ready(dqn_forward(x, prep))
    ref = reference_forward(x, params)
    assert out.shape == (batch, output_size)
    assert jnp.allclose(out, ref, atol=ATOL, rtol=RTOL), \
        float(jnp.max(jnp.abs(out - ref)))

    # Ragged batch (not a multiple of sublane/tile) -> split into 2 parallel steps.
    key, kx2 = jax.random.split(key)
    x2 = jax.random.normal(kx2, (37, input_size), jnp.float32)
    out2 = jax.block_until_ready(dqn_forward(x2, prep))
    assert out2.shape == (37, output_size)
    assert jnp.allclose(out2, reference_forward(x2, params), atol=ATOL, rtol=RTOL)

    # Multi-step grid (4 steps) with a small tile to exercise the batch index_map.
    key, kx3 = jax.random.split(key)
    x3 = jax.random.normal(kx3, (50, input_size), jnp.float32)
    out3 = jax.block_until_ready(dqn_forward(x3, prep, tb_max=16))
    assert out3.shape == (50, output_size)
    assert jnp.allclose(out3, reference_forward(x3, params), atol=ATOL, rtol=RTOL)

    print("KERNEL_OK")
</pallas_src>

<mosaic_0001>
module attributes {stable_mosaic.version = 11 : i64} {
  func.func @_dqn_kernel(%arg0: i32, %arg1: memref<8x16xbf16, #tpu.memory_space<vmem>>, %arg2: memref<16x128xbf16, #tpu.memory_space<vmem>>, %arg3: memref<1x128xf32, #tpu.memory_space<vmem>>, %arg4: memref<128x64xbf16, #tpu.memory_space<vmem>>, %arg5: memref<1x64xf32, #tpu.memory_space<vmem>>, %arg6: memref<64x32xbf16, #tpu.memory_space<vmem>>, %arg7: memref<1x32xf32, #tpu.memory_space<vmem>>, %arg8: memref<32x8xbf16, #tpu.memory_space<vmem>>, %arg9: memref<1x8xf32, #tpu.memory_space<vmem>>, %arg10: memref<8x8xf32, #tpu.memory_space<vmem>>) attributes {dimension_semantics = [#tpu.dimension_semantics<parallel>], iteration_bounds = array<i64: 1>, scalar_prefetch = 0 : i64, scratch_operands = 0 : i64, tpu.core_type = #tpu.core_type<tc>, window_params = [{transform_indices = @transform_0, window_bounds = array<i64: 8, 16>}, {pipeline_mode = #tpu.pipeline_mode<synchronous>, transform_indices = @transform_1, window_bounds = array<i64: 16, 128>}, {pipeline_mode = #tpu.pipeline_mode<synchronous>, transform_indices = @transform_2, window_bounds = array<i64: 1, 128>}, {pipeline_mode = #tpu.pipeline_mode<synchronous>, transform_indices = @transform_3, window_bounds = array<i64: 128, 64>}, {pipeline_mode = #tpu.pipeline_mode<synchronous>, transform_indices = @transform_4, window_bounds = array<i64: 1, 64>}, {pipeline_mode = #tpu.pipeline_mode<synchronous>, transform_indices = @transform_5, window_bounds = array<i64: 64, 32>}, {pipeline_mode = #tpu.pipeline_mode<synchronous>, transform_indices = @transform_6, window_bounds = array<i64: 1, 32>}, {pipeline_mode = #tpu.pipeline_mode<synchronous>, transform_indices = @transform_7, window_bounds = array<i64: 32, 8>}, {pipeline_mode = #tpu.pipeline_mode<synchronous>, transform_indices = @transform_8, window_bounds = array<i64: 1, 8>}, {transform_indices = @transform_9, window_bounds = array<i64: 8, 8>}]} {
    %c0 = arith.constant 0 : index
    %c0_0 = arith.constant 0 : index
    %0 = vector.load %arg1[%c0, %c0_0] : memref<8x16xbf16, #tpu.memory_space<vmem>>, vector<8x16xbf16>
    %c0_1 = arith.constant 0 : index
    %c0_2 = arith.constant 0 : index
    %1 = vector.load %arg2[%c0_1, %c0_2] : memref<16x128xbf16, #tpu.memory_space<vmem>>, vector<16x128xbf16>
    %cst = arith.constant dense<0.000000e+00> : vector<8x128xf32>
    %2 = tpu.matmul %0, %1, %cst {dimension_numbers = #tpu.dot_dimension_numbers<[1], [0], [0], [1], [0, 0, 1, 1], [], []>} : vector<8x16xbf16>, vector<16x128xbf16>, vector<8x128xf32> -> vector<8x128xf32>
    %c0_3 = arith.constant 0 : index
    %c0_4 = arith.constant 0 : index
    %3 = vector.load %arg3[%c0_3, %c0_4] : memref<1x128xf32, #tpu.memory_space<vmem>>, vector<1x128xf32>
    %4 = vector.broadcast %3 : vector<1x128xf32> to vector<8x128xf32>
    %5 = arith.addf %2, %4 : vector<8x128xf32>
    %cst_5 = arith.constant 0.000000e+00 : f32
    %6 = vector.broadcast %cst_5 : f32 to vector<8x128xf32>
    %7 = arith.maximumf %5, %6 : vector<8x128xf32>
    %8 = arith.truncf %7 : vector<8x128xf32> to vector<8x128xbf16>
    %c0_6 = arith.constant 0 : index
    %c0_7 = arith.constant 0 : index
    %9 = vector.load %arg4[%c0_6, %c0_7] : memref<128x64xbf16, #tpu.memory_space<vmem>>, vector<128x64xbf16>
    %cst_8 = arith.constant dense<0.000000e+00> : vector<8x64xf32>
    %10 = tpu.matmul %8, %9, %cst_8 {dimension_numbers = #tpu.dot_dimension_numbers<[1], [0], [0], [1], [0, 0, 1, 1], [], []>} : vector<8x128xbf16>, vector<128x64xbf16>, vector<8x64xf32> -> vector<8x64xf32>
    %c0_9 = arith.constant 0 : index
    %c0_10 = arith.constant 0 : index
    %11 = vector.load %arg5[%c0_9, %c0_10] : memref<1x64xf32, #tpu.memory_space<vmem>>, vector<1x64xf32>
    %12 = vector.broadcast %11 : vector<1x64xf32> to vector<8x64xf32>
    %13 = arith.addf %10, %12 : vector<8x64xf32>
    %cst_11 = arith.constant 0.000000e+00 : f32
    %14 = vector.broadcast %cst_11 : f32 to vector<8x64xf32>
    %15 = arith.maximumf %13, %14 : vector<8x64xf32>
    %16 = arith.truncf %15 : vector<8x64xf32> to vector<8x64xbf16>
    %c0_12 = arith.constant 0 : index
    %c0_13 = arith.constant 0 : index
    %17 = vector.load %arg6[%c0_12, %c0_13] : memref<64x32xbf16, #tpu.memory_space<vmem>>, vector<64x32xbf16>
    %cst_14 = arith.constant dense<0.000000e+00> : vector<8x32xf32>
    %18 = tpu.matmul %16, %17, %cst_14 {dimension_numbers = #tpu.dot_dimension_numbers<[1], [0], [0], [1], [0, 0, 1, 1], [], []>} : vector<8x64xbf16>, vector<64x32xbf16>, vector<8x32xf32> -> vector<8x32xf32>
    %c0_15 = arith.constant 0 : index
    %c0_16 = arith.constant 0 : index
    %19 = vector.load %arg7[%c0_15, %c0_16] : memref<1x32xf32, #tpu.memory_space<vmem>>, vector<1x32xf32>
    %20 = vector.broadcast %19 : vector<1x32xf32> to vector<8x32xf32>
    %21 = arith.addf %18, %20 : vector<8x32xf32>
    %cst_17 = arith.constant 0.000000e+00 : f32
    %22 = vector.broadcast %cst_17 : f32 to vector<8x32xf32>
    %23 = arith.maximumf %21, %22 : vector<8x32xf32>
    %24 = arith.truncf %23 : vector<8x32xf32> to vector<8x32xbf16>
    %c0_18 = arith.constant 0 : index
    %c0_19 = arith.constant 0 : index
    %25 = vector.load %arg8[%c0_18, %c0_19] : memref<32x8xbf16, #tpu.memory_space<vmem>>, vector<32x8xbf16>
    %cst_20 = arith.constant dense<0.000000e+00> : vector<8x8xf32>
    %26 = tpu.matmul %24, %25, %cst_20 {dimension_numbers = #tpu.dot_dimension_numbers<[1], [0], [0], [1], [0, 0, 1, 1], [], []>} : vector<8x32xbf16>, vector<32x8xbf16>, vector<8x8xf32> -> vector<8x8xf32>
    %c0_21 = arith.constant 0 : index
    %c0_22 = arith.constant 0 : index
    %27 = vector.load %arg9[%c0_21, %c0_22] : memref<1x8xf32, #tpu.memory_space<vmem>>, vector<1x8xf32>
    %28 = vector.broadcast %27 : vector<1x8xf32> to vector<8x8xf32>
    %29 = arith.addf %26, %28 : vector<8x8xf32>
    %c0_23 = arith.constant 0 : index
    %c0_24 = arith.constant 0 : index
    %30 = vector.load %arg10[%c0_23, %c0_24] : memref<8x8xf32, #tpu.memory_space<vmem>>, vector<8x8xf32>
    tpu.vector_store %arg10[%c0_23, %c0_24], %29 {strides = array<i32>} : memref<8x8xf32, #tpu.memory_space<vmem>>, vector<8x8xf32>,
    return
  }
  func.func @transform_0(%arg0: i32) -> (i32, i32) {
    %c0_i32 = arith.constant 0 : i32
    %c0_i32_0 = arith.constant 0 : i32
    return %arg0, %c0_i32 : i32, i32
  }
  func.func @transform_1(%arg0: i32) -> (i32, i32) {
    %c0_i32 = arith.constant 0 : i32
    %c0_i32_0 = arith.constant 0 : i32
    %c0_i32_1 = arith.constant 0 : i32
    return %c0_i32, %c0_i32_0 : i32, i32
  }
  func.func @transform_2(%arg0: i32) -> (i32, i32) {
    %c0_i32 = arith.constant 0 : i32
    %c0_i32_0 = arith.constant 0 : i32
    %c0_i32_1 = arith.constant 0 : i32
    return %c0_i32, %c0_i32_0 : i32, i32
  }
  func.func @transform_3(%arg0: i32) -> (i32, i32) {
    %c0_i32 = arith.constant 0 : i32
    %c0_i32_0 = arith.constant 0 : i32
    %c0_i32_1 = arith.constant 0 : i32
    return %c0_i32, %c0_i32_0 : i32, i32
  }
  func.func @transform_4(%arg0: i32) -> (i32, i32) {
    %c0_i32 = arith.constant 0 : i32
    %c0_i32_0 = arith.constant 0 : i32
    %c0_i32_1 = arith.constant 0 : i32
    return %c0_i32, %c0_i32_0 : i32, i32
  }
  func.func @transform_5(%arg0: i32) -> (i32, i32) {
    %c0_i32 = arith.constant 0 : i32
    %c0_i32_0 = arith.constant 0 : i32
    %c0_i32_1 = arith.constant 0 : i32
    return %c0_i32, %c0_i32_0 : i32, i32
  }
  func.func @transform_6(%arg0: i32) -> (i32, i32) {
    %c0_i32 = arith.constant 0 : i32
    %c0_i32_0 = arith.constant 0 : i32
    %c0_i32_1 = arith.constant 0 : i32
    return %c0_i32, %c0_i32_0 : i32, i32
  }
  func.func @transform_7(%arg0: i32) -> (i32, i32) {
    %c0_i32 = arith.constant 0 : i32
    %c0_i32_0 = arith.constant 0 : i32
    %c0_i32_1 = arith.constant 0 : i32
    return %c0_i32, %c0_i32_0 : i32, i32
  }
  func.func @transform_8(%arg0: i32) -> (i32, i32) {
    %c0_i32 = arith.constant 0 : i32
    %c0_i32_0 = arith.constant 0 : i32
    %c0_i32_1 = arith.constant 0 : i32
    return %c0_i32, %c0_i32_0 : i32, i32
  }
  func.func @transform_9(%arg0: i32) -> (i32, i32) {
    %c0_i32 = arith.constant 0 : i32
    %c0_i32_0 = arith.constant 0 : i32
    return %arg0, %c0_i32 : i32, i32
  }
}

</mosaic_0001>

<bundles_post_ra>
// kernel: dqn_forward.1
= control target key start
LH: loop header
LB: loop body
LE: loop exit
PB: predicated region body
PF: predicated region fallthrough
CT: control target
= control target key end

     0   :  { %v470_v0 = vmov 0.0   ;;  %vm471_vm0 = vmmov 0   ;;  %vm49_vm1 = vcmask 130048   ;;  %vm247_vm2 = vcmask 523264   ;;  %s608_s1 = inlined_call_operand.vmem [shape: bf16[16,128], index: 1, kind: input, shape index: {}]   ;;  %s609_s0 = inlined_call_operand.vmem [shape: bf16[8,16], index: 0, kind: input, shape index: {}]   ;;  %s610_s3 = inlined_call_operand.vmem [shape: bf16[128,64], index: 3, kind: input, shape index: {}]   ;;  %s611_s5 = inlined_call_operand.vmem [shape: bf16[64,32], index: 5, kind: input, shape index: {}]   ;;  %s612_s2 = inlined_call_operand.vmem [shape: f32[1,128], index: 2, kind: input, shape index: {}]   ;;  %s613_s7 = inlined_call_operand.vmem [shape: bf16[32,8], index: 7, kind: input, shape index: {}]   ;;  %s614_s4 = inlined_call_operand.vmem [shape: f32[1,64], index: 4, kind: input, shape index: {}]   ;;  %s615_s6 = inlined_call_operand.vmem [shape: f32[1,32], index: 6, kind: input, shape index: {}]   ;;  %s616_s8 = inlined_call_operand.vmem [shape: f32[1,8], index: 8, kind: input, shape index: {}]   ;;  %s617_s9 = inlined_call_operand.vmem [shape: f32[8,8], index: 9, kind: output, shape index: {}]  }
   0x1   :  { %407 = vmatprep.subr.bf16.mxu0 %v470_v0  ;;  %v455_v1 = vld [vmem:[%s608_s1] sm:$0xff]   ;;  %409 = vmatprep.mubr.msk.bf16.mxu0 %vm471_vm0, %v470_v0  ;;  %v456_v3 = vld [vmem:[%s610_s3 + $0x38] sm:$0xff]   ;;  %v457_v4 = vld [vmem:[%s610_s3 + $0x30] sm:$0xff]   ;;  %vm316_vm3 = vcmask 261120   ;;  %vm360_vm4 = vcmask 64512  }
   0x2   :  { %v33_v2 = vld [vmem:[%s609_s0] sm:$0xf]  ;;  %413 = vmatprep.subr.bf16.mxu1 %v470_v0  ;;  %429 = vmatprep.mubr.msk.bf16.mxu1 %vm471_vm0, %v470_v0  ;;  %v458_v5 = vld [vmem:[%s610_s3 + $0x28] sm:$0xff]   ;;  %v460_v7 = vld [vmem:[%s610_s3 + $0x18] sm:$0xff]  }
   0x3   :  { %408 = vmatpush3.bf16.msra.mxu0 %v455_v1  ;;  %414 = vmatpush3.bf16.msra.mxu1 %v456_v3  ;;  %v459_v6 = vld [vmem:[%s610_s3 + $0x20] sm:$0xff]   ;;  %v461_v8 = vld [vmem:[%s610_s3 + $0x10] sm:$0xff]   ;;  %v462_v9 = vld [vmem:[%s610_s3 + $0x8] sm:$0xff]  }
   0x4   :  { %433 = vmatprep.subr.bf16.mxu0 %v470_v0  ;;  %415 = vmatprep.subr.bf16.mxu1 %v470_v0  ;;  %v463_v10 = vld [vmem:[%s610_s3] sm:$0xff]   ;;  %v464_v11 = vld [vmem:[%s611_s5 + $0x18] sm:$0xff]   ;;  %v465_v12 = vld [vmem:[%s611_s5 + $0x10] sm:$0xff]  }
   0x5   :  { %v366_v13 = vld [vmem:[%s612_s2] ss:$0 sm:$0xff]  ;;  %v466_v21 = vld [vmem:[%s611_s5 + $0x8] sm:$0xff]  }
   0x6   :  { %410 = vmatmul.mubr.msk.bf16.vlgmr.msra.gmra.mxu0 %vm49_vm1, %v33_v2  ;;  %v467_v22 = vld [vmem:[%s611_s5] sm:$0xff]   ;;  %v468_v29 = vld [vmem:[%s613_s7 + $0x8] sm:$0xff]  }
   0x7   :  { %441 = vmatprep.mubr.msk.bf16.mxu0 %vm471_vm0, %v470_v0  ;;  %416 = vmatpush3.bf16.msra.mxu1 %v457_v4  ;;  %v369_v23 = vld [vmem:[%s614_s4] ss:$0 sm:$0xff] }
   0x8   :  { %417 = vmatprep.subr.bf16.mxu1 %v470_v0  ;;  %434 = vmatpush3.bf16.msra.mxu0 %v464_v11  ;;  %v469_v32 = vld [vmem:[%s613_s7] sm:$0xff]  }
   0x9   :  { %435 = vmatprep.subr.bf16.mxu0 %v470_v0  ;;  %v378_v33 = vld [vmem:[%s615_s6] ss:$0 sm:$0xff] }
   0xa   :  { %v384_v41 = vld [vmem:[%s616_s8] ss:$0 sm:$0xff] }
   0xb   :  { %418 = vmatpush3.bf16.msra.mxu1 %v458_v5 }
   0xc   :  { %419 = vmatprep.subr.bf16.mxu1 %v470_v0  ;;  %436 = vmatpush3.bf16.msra.mxu0 %v465_v12 }
   0xd   :  { %437 = vmatprep.subr.bf16.mxu0 %v470_v0 }
   0xf   :  { %420 = vmatpush3.bf16.msra.mxu1 %v459_v6 }
  0x10   :  { %421 = vmatprep.subr.bf16.mxu1 %v470_v0  ;;  %438 = vmatpush3.bf16.msra.mxu0 %v466_v21 }
  0x11   :  { %439 = vmatprep.subr.bf16.mxu0 %v470_v0 }
  0x13   :  { %422 = vmatpush3.bf16.msra.mxu1 %v460_v7 }
  0x14   :  { %423 = vmatprep.subr.bf16.mxu1 %v470_v0  ;;  %440 = vmatpush3.bf16.msra.mxu0 %v467_v22 }
  0x15   :  { %445 = vmatprep.subr.bf16.mxu0 %v470_v0 }
  0x17   :  { %424 = vmatpush3.bf16.msra.mxu1 %v461_v8 }
  0x18   :  { %425 = vmatprep.subr.bf16.mxu1 %v470_v0 }
  0x1b   :  { %426 = vmatpush3.bf16.msra.mxu1 %v462_v9 }
  0x1c   :  { %427 = vmatprep.subr.bf16.mxu1 %v470_v0 }
  0x1f   :  { %428 = vmatpush3.bf16.msra.mxu1 %v463_v10 }
  0xc6   :  { %v87_v14 = vpop.f32.mrf.mxu0 }
  0xc7   :  { %v88_v15 = vadd.f32 %v366_v13, %v87_v14 }
  0xc8   :  { %v411_v16 = vpop.f32.mrf.mxu0 }
  0xc9   :  { %v93_v17 = vmax.f32 %v88_v15, 0.0 }
  0xca   :  { %v90_v18 = vpop.f32.mrf.mxu0 }
  0xcb   :  { %v94_v19 = vpack.c.bf16 %v93_v17, %v93_v17 }
  0xcc   :  { %v412_v20 = vpop.f32.mrf.mxu0 }
  0xcd   :  { %430 = vmatmul.mubr.bf16.vlgmr.msra.gmra.mxu1 %v94_v19 }
 0x18d   :  { %v200_v24 = vpop.f32.mrf.mxu1 }
 0x18e   :  { %v201_v25 = vadd.f32 %v369_v23, %v200_v24 }
 0x18f   :  { %v431_v26 = vpop.f32.mrf.mxu1 }
 0x190   :  { %v206_v27 = vmax.f32 %v201_v25, 0.0 }
 0x191   :  { %v203_v28 = vpop.f32.mrf.mxu1 }
 0x192   :  { %v207_v30 = vpack.c.bf16 %v206_v27, %v206_v27 }
 0x193   :  { %v432_v31 = vpop.f32.mrf.mxu1 }
 0x194   :  { %442 = vmatmul.mubr.msk.bf16.vlgmr.msra.gmra.mxu0 %vm247_vm2, %v207_v30 }
 0x195   :  { %446 = vmatpush3.bf16.msra.mxu0 %v468_v29  ;;  %449 = vmatprep.mubr.msk.bf16.mxu0 %vm471_vm0, %v470_v0 }
 0x196   :  { %447 = vmatprep.subr.bf16.mxu0 %v470_v0 }
 0x199   :  { %448 = vmatpush3.bf16.msra.mxu0 %v469_v32 }
 0x254   :  { %v285_v34 = vpop.f32.mrf.mxu0 }
 0x255   :  { %v286_v35 = vadd.f32 %v378_v33, %v285_v34 }
 0x256   :  { %v443_v36 = vpop.f32.mrf.mxu0 }
 0x257   :  { %v291_v37 = vmax.f32 %v286_v35, 0.0 }
 0x258   :  { %v288_v38 = vpop.f32.mrf.mxu0 }
 0x259   :  { %v292_v39 = vpack.c.bf16 %v291_v37, %v291_v37 }
 0x25a   :  { %v444_v40 = vpop.f32.mrf.mxu0 }
 0x25b   :  { %450 = vmatmul.mubr.msk.bf16.vlgmr.msra.gmra.mxu0 %vm316_vm3, %v292_v39 }
 0x31b   :  { %v354_v42 = vpop.f32.mrf.mxu0 }
 0x31c   :  { %v355_v43 = vadd.f32 %v384_v41, %v354_v42 }
 0x31d   :  { %v451_v44 = vpop.f32.mrf.mxu0 }
 0x31e   :  { %361 = vst.msk [vmem:[%s617_s9] sm:$0xff] %vm360_vm4, %v355_v43 }
 0x31f   :  { %v357_v45 = vpop.f32.mrf.mxu0 }
 0x321   :  { %v452_v46 = vpop.f32.mrf.mxu0 }

</bundles_post_ra>
